<compile_context>
chip_gen: v6e
topology: v6e:2x2x1
jax: 0.10.0
libtpu: 0.0.40
codegen_flags: <defaults>
</compile_context>

<pallas_src>
import jax
import jax.numpy as jnp
from jax import lax
from jax.experimental import pallas as pl
from jax.experimental.pallas import tpu as pltpu  # noqa: F401  (TPU backend assumed)

BN_EPS = 1e-5


def _round_up(v: int, m: int) -> int:
    return ((v + m - 1) // m) * m


def _make_resblock_kernel(n_true: int, n_pad: int):
    """Build the fused kernel for a given (true, padded) batch size."""
    inv_n = 1.0 / float(n_true)
    need_row_mask = n_pad != n_true

    def kernel(x_ref, w1_ref, w2_ref, bn_ref, o_ref):
        x = x_ref[...]                                    # (Np, Fp) f32
        mxu_dtype = w1_ref.dtype                          # bf16 (or f32) operands

        # ---- Linear 1 (bias omitted: cancelled by the BN mean subtraction) ----
        h1 = jnp.dot(x.astype(mxu_dtype), w1_ref[...],
                     preferred_element_type=jnp.float32)

        # ---- BatchNorm 1 (training mode, biased variance), one-pass stats ----
        # Padded rows/cols of h1 are exactly zero (zero-padded x / weights, no
        # bias), so sums over the padded tile divided by the true batch size
        # give the correct statistics.
        m1 = jnp.sum(h1, axis=0, keepdims=True) * inv_n
        q1 = jnp.sum(h1 * h1, axis=0, keepdims=True) * inv_n
        v1 = jnp.maximum(q1 - m1 * m1, 0.0)
        scale1 = bn_ref[0:1, :] * lax.rsqrt(v1 + BN_EPS)
        shift1 = bn_ref[1:2, :] - m1 * scale1
        a1 = jnp.maximum(h1 * scale1 + shift1, 0.0)       # BN1 + ReLU

        if need_row_mask:
            # Zero padded batch rows so they cannot pollute BN-2 statistics.
            rows = lax.broadcasted_iota(jnp.int32, (n_pad, 1), 0)
            a1 = jnp.where(rows < n_true, a1, 0.0)

        # ---- Linear 2 ----
        h2 = jnp.dot(a1.astype(mxu_dtype), w2_ref[...],
                     preferred_element_type=jnp.float32)

        # ---- BatchNorm 2 ----
        m2 = jnp.sum(h2, axis=0, keepdims=True) * inv_n
        q2 = jnp.sum(h2 * h2, axis=0, keepdims=True) * inv_n
        v2 = jnp.maximum(q2 - m2 * m2, 0.0)
        scale2 = bn_ref[2:3, :] * lax.rsqrt(v2 + BN_EPS)
        shift2 = bn_ref[3:4, :] - m2 * scale2

        # ---- residual add + ReLU ----
        o_ref[...] = jnp.maximum(h2 * scale2 + shift2 + x, 0.0).astype(o_ref.dtype)

    return kernel


def prepare_params(raw, num_features, weight_dtype=jnp.bfloat16):
    """One-time conversion of PyTorch-layout params into kernel-ready form.

    Pre-transposes the Linear weights, zero-pads features to a multiple of 128,
    casts the weights to `weight_dtype` (bf16 for MXU throughput) and packs the
    four per-feature BN params into one (4, Fp) f32 array.  Linear biases are
    intentionally dropped: training-mode BatchNorm cancels them exactly.
    """
    f_pad = _round_up(num_features, 128)
    pad_f = f_pad - num_features

    def prep_w(w):  # (F_out, F_in) -> padded (Fp_in, Fp_out) so the kernel does x @ w_t
        wt = jnp.asarray(w, jnp.float32).T
        wt = jnp.pad(wt, ((0, pad_f), (0, pad_f)))
        return wt.astype(weight_dtype)

    def prep_v(v):  # (F,) -> (Fp,)  (zero padding keeps padded feature lanes at 0)
        return jnp.pad(jnp.asarray(v, jnp.float32), (0, pad_f))

    bn_pack = jnp.stack([prep_v(raw["g1"]), prep_v(raw["be1"]),
                         prep_v(raw["g2"]), prep_v(raw["be2"])]).astype(jnp.float32)
    return {"w1t": prep_w(raw["w1"]), "w2t": prep_w(raw["w2"]),
            "bn": bn_pack, "num_features": num_features}


def resblock_forward(x, kparams):
    """x: (N, F) float32.  kparams: output of prepare_params."""
    N, F = x.shape
    assert F == kparams["num_features"]
    Fp = kparams["w1t"].shape[0]
    Np = _round_up(max(N, 8), 8)

    x_p = x if (Np, Fp) == (N, F) else jnp.pad(x, ((0, Np - N), (0, Fp - F)))

    kernel = _make_resblock_kernel(n_true=N, n_pad=Np)
    full2d = lambda shape: pl.BlockSpec(shape, lambda: (0, 0))

    w_bytes = kparams["w1t"].dtype.itemsize
    cost = pl.CostEstimate(
        flops=2 * 2 * Np * Fp * Fp + 12 * Np * Fp,        # 2 matmuls + elementwise
        transcendentals=2 * Fp,                            # two rsqrt per feature
        bytes_accessed=2 * Np * Fp * 4 + 2 * Fp * Fp * w_bytes + 4 * Fp * 4,
    )

    out_p = pl.pallas_call(
        kernel,
        out_shape=jax.ShapeDtypeStruct((Np, Fp), jnp.float32),
        grid=(),
        in_specs=[
            full2d((Np, Fp)),   # x (padded)
            full2d((Fp, Fp)),   # w1^T (padded, bf16/f32)
            full2d((Fp, Fp)),   # w2^T (padded, bf16/f32)
            full2d((4, Fp)),    # packed [g1, be1, g2, be2]
        ],
        out_specs=full2d((Np, Fp)),
        cost_estimate=cost,
    )(x_p, kparams["w1t"], kparams["w2t"], kparams["bn"])

    if (Np, Fp) != (N, F):
        out_p = out_p[:N, :F]
    return out_p


def init_raw_params(key, num_features):
    """PyTorch-layout parameters (nn.Linear / nn.BatchNorm1d shapes & init)."""
    k1, k2, k3, k4 = jax.random.split(key, 4)
    bound = 1.0 / jnp.sqrt(num_features)
    return {
        "w1": jax.random.uniform(k1, (num_features, num_features),
                                 jnp.float32, -bound, bound),
        "b1": jax.random.uniform(k2, (num_features,), jnp.float32, -bound, bound),
        "g1": jnp.ones((num_features,), jnp.float32),
        "be1": jnp.zeros((num_features,), jnp.float32),
        "w2": jax.random.uniform(k3, (num_features, num_features),
                                 jnp.float32, -bound, bound),
        "b2": jax.random.uniform(k4, (num_features,), jnp.float32, -bound, bound),
        "g2": jnp.ones((num_features,), jnp.float32),
        "be2": jnp.zeros((num_features,), jnp.float32),
    }


def _reference(x, p):
    """Module-faithful f32 forward (PyTorch training-mode BatchNorm1d, with biases)."""
    def bn(h, g, b):
        m = jnp.mean(h, axis=0, keepdims=True)
        v = jnp.mean((h - m) ** 2, axis=0, keepdims=True)
        return g * (h - m) / jnp.sqrt(v + BN_EPS) + b
    h1 = x @ p["w1"].T + p["b1"]
    a1 = jnp.maximum(bn(h1, p["g1"], p["be1"]), 0.0)
    h2 = a1 @ p["w2"].T + p["b2"]
    return jnp.maximum(bn(h2, p["g2"], p["be2"]) + x, 0.0)


if __name__ == "__main__":
    num_features = 32
    batch = 64                       # multiple of 8 sublanes; realistic BN batch
    key = jax.random.PRNGKey(0)
    kx, kp = jax.random.split(key)
    x = jax.random.normal(kx, (batch, num_features), jnp.float32)
    raw = init_raw_params(kp, num_features)
    ref = _reference(x, raw)

    # 1) f32-weight path: tight check of the fused-kernel mechanics
    #    (padding, packed BN params, folded scale/shift, bias cancellation).
    out_f32 = resblock_forward(x, prepare_params(raw, num_features, jnp.float32))
    jax.block_until_ready(out_f32)
    assert jnp.allclose(out_f32, ref, atol=1e-4, rtol=1e-4), "f32 kernel mismatch"

    # 2) bf16-weight path (production/perf mode): tolerance sized for bf16
    #    matmul operands (eps ~ 3.9e-3) amplified through two batch-norms.
    out_bf16 = resblock_forward(x, prepare_params(raw, num_features, jnp.bfloat16))
    jax.block_until_ready(out_bf16)
    assert jnp.allclose(out_bf16, ref, atol=5e-2, rtol=5e-2), "bf16 kernel mismatch"

    print("KERNEL_OK")
</pallas_src>

<mosaic_0001>
module attributes {stable_mosaic.version = 11 : i64} {
  func.func @kernel(%arg0: memref<64x128xf32, #tpu.memory_space<vmem>>, %arg1: memref<128x128xf32, #tpu.memory_space<vmem>>, %arg2: memref<128x128xf32, #tpu.memory_space<vmem>>, %arg3: memref<4x128xf32, #tpu.memory_space<vmem>>, %arg4: memref<64x128xf32, #tpu.memory_space<vmem>>) attributes {dimension_semantics = [], scalar_prefetch = 0 : i64, scratch_operands = 0 : i64, tpu.core_type = #tpu.core_type<tc>} {
    %c0 = arith.constant 0 : index
    %c0_0 = arith.constant 0 : index
    %0 = vector.load %arg0[%c0, %c0_0] : memref<64x128xf32, #tpu.memory_space<vmem>>, vector<64x128xf32>
    %c0_1 = arith.constant 0 : index
    %c0_2 = arith.constant 0 : index
    %1 = vector.load %arg1[%c0_1, %c0_2] : memref<128x128xf32, #tpu.memory_space<vmem>>, vector<128x128xf32>
    %cst = arith.constant dense<0.000000e+00> : vector<64x128xf32>
    %2 = tpu.matmul %0, %1, %cst {dimension_numbers = #tpu.dot_dimension_numbers<[1], [0], [0], [1], [0, 0, 1, 1], [], []>} : vector<64x128xf32>, vector<128x128xf32>, vector<64x128xf32> -> vector<64x128xf32>
    %cst_3 = arith.constant dense<0.000000e+00> : vector<128xf32>
    %3 = vector.multi_reduction <add>, %2, %cst_3 [0] : vector<64x128xf32> to vector<128xf32>
    %4 = vector.shape_cast %3 : vector<128xf32> to vector<1x128xf32>
    %cst_4 = arith.constant 1.562500e-02 : f32
    %5 = vector.broadcast %cst_4 : f32 to vector<1x128xf32>
    %6 = arith.mulf %4, %5 : vector<1x128xf32>
    %7 = arith.mulf %2, %2 : vector<64x128xf32>
    %cst_5 = arith.constant dense<0.000000e+00> : vector<128xf32>
    %8 = vector.multi_reduction <add>, %7, %cst_5 [0] : vector<64x128xf32> to vector<128xf32>
    %9 = vector.shape_cast %8 : vector<128xf32> to vector<1x128xf32>
    %cst_6 = arith.constant 1.562500e-02 : f32
    %10 = vector.broadcast %cst_6 : f32 to vector<1x128xf32>
    %11 = arith.mulf %9, %10 : vector<1x128xf32>
    %12 = arith.mulf %6, %6 : vector<1x128xf32>
    %13 = arith.subf %11, %12 : vector<1x128xf32>
    %cst_7 = arith.constant 0.000000e+00 : f32
    %14 = vector.broadcast %cst_7 : f32 to vector<1x128xf32>
    %15 = arith.maximumf %13, %14 : vector<1x128xf32>
    %c0_8 = arith.constant 0 : index
    %c0_9 = arith.constant 0 : index
    %16 = vector.load %arg3[%c0_8, %c0_9] : memref<4x128xf32, #tpu.memory_space<vmem>>, vector<1x128xf32>
    %cst_10 = arith.constant 9.99999974E-6 : f32
    %17 = vector.broadcast %cst_10 : f32 to vector<1x128xf32>
    %18 = arith.addf %15, %17 : vector<1x128xf32>
    %19 = math.rsqrt %18 : vector<1x128xf32>
    %20 = arith.mulf %16, %19 : vector<1x128xf32>
    %c1 = arith.constant 1 : index
    %c0_11 = arith.constant 0 : index
    %21 = vector.load %arg3[%c1, %c0_11] : memref<4x128xf32, #tpu.memory_space<vmem>>, vector<1x128xf32>
    %22 = arith.mulf %6, %20 : vector<1x128xf32>
    %23 = arith.subf %21, %22 : vector<1x128xf32>
    %24 = vector.broadcast %20 : vector<1x128xf32> to vector<64x128xf32>
    %25 = arith.mulf %2, %24 : vector<64x128xf32>
    %26 = vector.broadcast %23 : vector<1x128xf32> to vector<64x128xf32>
    %27 = arith.addf %25, %26 : vector<64x128xf32>
    %cst_12 = arith.constant 0.000000e+00 : f32
    %28 = vector.broadcast %cst_12 : f32 to vector<64x128xf32>
    %29 = arith.maximumf %27, %28 : vector<64x128xf32>
    %c0_13 = arith.constant 0 : index
    %c0_14 = arith.constant 0 : index
    %30 = vector.load %arg2[%c0_13, %c0_14] : memref<128x128xf32, #tpu.memory_space<vmem>>, vector<128x128xf32>
    %cst_15 = arith.constant dense<0.000000e+00> : vector<64x128xf32>
    %31 = tpu.matmul %29, %30, %cst_15 {dimension_numbers = #tpu.dot_dimension_numbers<[1], [0], [0], [1], [0, 0, 1, 1], [], []>} : vector<64x128xf32>, vector<128x128xf32>, vector<64x128xf32> -> vector<64x128xf32>
    %cst_16 = arith.constant dense<0.000000e+00> : vector<128xf32>
    %32 = vector.multi_reduction <add>, %31, %cst_16 [0] : vector<64x128xf32> to vector<128xf32>
    %33 = vector.shape_cast %32 : vector<128xf32> to vector<1x128xf32>
    %cst_17 = arith.constant 1.562500e-02 : f32
    %34 = vector.broadcast %cst_17 : f32 to vector<1x128xf32>
    %35 = arith.mulf %33, %34 : vector<1x128xf32>
    %36 = arith.mulf %31, %31 : vector<64x128xf32>
    %cst_18 = arith.constant dense<0.000000e+00> : vector<128xf32>
    %37 = vector.multi_reduction <add>, %36, %cst_18 [0] : vector<64x128xf32> to vector<128xf32>
    %38 = vector.shape_cast %37 : vector<128xf32> to vector<1x128xf32>
    %cst_19 = arith.constant 1.562500e-02 : f32
    %39 = vector.broadcast %cst_19 : f32 to vector<1x128xf32>
    %40 = arith.mulf %38, %39 : vector<1x128xf32>
    %41 = arith.mulf %35, %35 : vector<1x128xf32>
    %42 = arith.subf %40, %41 : vector<1x128xf32>
    %cst_20 = arith.constant 0.000000e+00 : f32
    %43 = vector.broadcast %cst_20 : f32 to vector<1x128xf32>
    %44 = arith.maximumf %42, %43 : vector<1x128xf32>
    %c2 = arith.constant 2 : index
    %c0_21 = arith.constant 0 : index
    %45 = vector.load %arg3[%c2, %c0_21] : memref<4x128xf32, #tpu.memory_space<vmem>>, vector<1x128xf32>
    %cst_22 = arith.constant 9.99999974E-6 : f32
    %46 = vector.broadcast %cst_22 : f32 to vector<1x128xf32>
    %47 = arith.addf %44, %46 : vector<1x128xf32>
    %48 = math.rsqrt %47 : vector<1x128xf32>
    %49 = arith.mulf %45, %48 : vector<1x128xf32>
    %c3 = arith.constant 3 : index
    %c0_23 = arith.constant 0 : index
    %50 = vector.load %arg3[%c3, %c0_23] : memref<4x128xf32, #tpu.memory_space<vmem>>, vector<1x128xf32>
    %51 = arith.mulf %35, %49 : vector<1x128xf32>
    %52 = arith.subf %50, %51 : vector<1x128xf32>
    %53 = vector.broadcast %49 : vector<1x128xf32> to vector<64x128xf32>
    %54 = arith.mulf %31, %53 : vector<64x128xf32>
    %55 = vector.broadcast %52 : vector<1x128xf32> to vector<64x128xf32>
    %56 = arith.addf %54, %55 : vector<64x128xf32>
    %57 = arith.addf %56, %0 : vector<64x128xf32>
    %cst_24 = arith.constant 0.000000e+00 : f32
    %58 = vector.broadcast %cst_24 : f32 to vector<64x128xf32>
    %59 = arith.maximumf %57, %58 : vector<64x128xf32>
    %c0_25 = arith.constant 0 : index
    %c0_26 = arith.constant 0 : index
    %60 = vector.load %arg4[%c0_25, %c0_26] : memref<64x128xf32, #tpu.memory_space<vmem>>, vector<64x128xf32>
    tpu.vector_store %arg4[%c0_25, %c0_26], %59 {strides = array<i32>} : memref<64x128xf32, #tpu.memory_space<vmem>>, vector<64x128xf32>,
    return
  }
}

</mosaic_0001>

<bundles_post_ra>
// kernel: tpu_custom_call.1
= control target key start
LH: loop header
LB: loop body
LE: loop exit
PB: predicated region body
PF: predicated region fallthrough
CT: control target
= control target key end

     0   :  { %9 = vsyncpa [#allocation3], 0  ;;  %s854_s0 = inlined_call_operand.hbm [shape: f32[64,128], index: 0, kind: input, shape index: {}]   ;;  %s855_s1 = inlined_call_operand.hbm [shape: f32[128,128], index: 1, kind: input, shape index: {}]   ;;  %s856_s2 = inlined_call_operand.hbm [shape: f32[128,128], index: 2, kind: input, shape index: {}]   ;;  %s857_s3 = inlined_call_operand.vmem [shape: f32[4,128], index: 3, kind: input, shape index: {}]   ;;  %s858_s4 = inlined_call_operand.hbm [shape: f32[64,128], index: 4, kind: output, shape index: {}]  }
   0x1   :  { %10 = vsyncpa [#allocation6], 0 }
   0x2   :  { %11 = vsyncpa [#allocation4], 0  ;;  %s731_s15 = smov [#allocation5]   ;;  %s732_s17 = smov [#allocation2]  }
   0x3   :  { %s29_s16 = sshll.u32 %s731_s15, 4  ;;  %s17_s18 = sshll.u32 %s732_s17, 4  ;;  %s30_s16 = int_to_ptr.vmem [resolvable:$true] %s29_s16  ;;  %s18_s18 = int_to_ptr.vmem [resolvable:$true] %s17_s18 }
   0x4   :  { %s653_s19 = scalar_lea.vmem %s30_s16, 2048  ;;  %p658_p1 = scmp.lt.s32.totalorder %s30_s16, %s30_s16 }
   0x5   :  { %p654_p0 = scmp.ne.s32.totalorder %s30_s16, %s653_s19  ;;  %p659_p2 = scmp.lt.s32.totalorder %s653_s19, %s653_s19 }
   0x7   :  { %p660_p3 = por %p659_p2, %p658_p1 }
   0x9   :  { %p661_p4 = pnand %p660_p3, %p654_p0 }
   0xb   :  { %664 = shalt.err (!%p661_p4)
}
   0xc   :  { %s733_s20 = smov 128   ;;  %s734_s21 = smov 8  }
   0xd   :  { %35 = dma.hbm_to_vmem [thread:$0]  %s855_s1, 2048, %s30_s16, [#allocation6], %s733_s20, %s733_s20, %s734_s21  }
   0xe   :  { %s673_s24 = scalar_lea.vmem %s18_s18, 1024  ;;  %p678_p6 = scmp.lt.s32.totalorder %s18_s18, %s18_s18 }
   0xf   :  { %p674_p5 = scmp.ne.s32.totalorder %s18_s18, %s673_s24  ;;  %p679_p7 = scmp.lt.s32.totalorder %s673_s24, %s673_s24 }
  0x11   :  { %p680_p8 = por %p679_p7, %p678_p6 }
  0x13   :  { %p681_p9 = pnand %p680_p8, %p674_p5 }
  0x15   :  { %684 = shalt.err (!%p681_p9)
}
  0x16   :  { %23 = dma.hbm_to_vmem [thread:$0]  %s854_s0, 1024, %s18_s18, [#allocation3], %s733_s20, %s733_s20, %s734_s21  }
  0x17   :  { %s735_s27 = smov [#allocation7]  }
  0x18   :  { %s41_s28 = sshll.u32 %s735_s27, 4  ;;  %s42_s28 = int_to_ptr.vmem [resolvable:$true] %s41_s28 }
  0x19   :  { %s693_s29 = scalar_lea.vmem %s42_s28, 2048  ;;  %p698_p11 = scmp.lt.s32.totalorder %s42_s28, %s42_s28 }
  0x1a   :  { %p694_p10 = scmp.ne.s32.totalorder %s42_s28, %s693_s29  ;;  %p699_p12 = scmp.lt.s32.totalorder %s693_s29, %s693_s29 }
  0x1c   :  { %p700_p13 = por %p699_p12, %p698_p11 }
  0x1e   :  { %p701_p0 = pnand %p700_p13, %p694_p10 }
  0x20   :  { %704 = shalt.err (!%p701_p0)
}
  0x21   :  { %47 = dma.hbm_to_vmem [thread:$0]  %s856_s2, 2048, %s42_s28, [#allocation6], %s733_s20, %s733_s20, %s734_s21  }
  0x22   :  { %725 = dma.done.wait [#allocation3], 1024  }
  0x23   :  { %726 = vsyncadd [#allocation3], 4294966272 }
  0x24   :  { %727 = dma.done.wait [#allocation6], 4096  }
  0x25   :  { %728 = vsyncadd [#allocation6], 4294963200  ;;  %v82_v0 = vld [vmem:[#allocation5 + $0x78] sm:$0xff]  ;;  %v81_v1 = vld [vmem:[#allocation5 + $0x70] sm:$0xff] }
  0x26   :  { %547 = vmatprep.subr.mxu0 %v82_v0  ;;  %v80_v2 = vld [vmem:[#allocation5 + $0x68] sm:$0xff]  ;;  %v79_v3 = vld [vmem:[#allocation5 + $0x60] sm:$0xff]  ;;  %v78_v5 = vld [vmem:[#allocation5 + $0x58] sm:$0xff] }
  0x27   :  { %548 = vmatpush3.msra.mxu0 %v82_v0  ;;  %v780_v4 = vld [vmem:[#allocation2] sm:$0xff]  ;;  %v77_v6 = vld [vmem:[#allocation5 + $0x50] sm:$0xff]  ;;  %v76_v7 = vld [vmem:[#allocation5 + $0x48] sm:$0xff] }
  0x28   :  { %549 = vmatprep.subr.mxu0 %v81_v1  ;;  %579 = vmatprep.mubr.f32.mxu0 %v780_v4  ;;  %v75_v8 = vld [vmem:[#allocation5 + $0x40] sm:$0xff]  ;;  %v74_v9 = vld [vmem:[#allocation5 + $0x38] sm:$0xff]  ;;  %v73_v10 = vld [vmem:[#allocation5 + $0x30] sm:$0xff] }
  0x29   :  { %550 = vmatpush3.msra.mxu0 %v81_v1  ;;  %v72_v11 = vld [vmem:[#allocation5 + $0x28] sm:$0xff]  ;;  %v71_v12 = vld [vmem:[#allocation5 + $0x20] sm:$0xff]  ;;  %v70_v13 = vld [vmem:[#allocation5 + $0x18] sm:$0xff] }
  0x2a   :  { %551 = vmatprep.subr.mxu0 %v80_v2  ;;  %v69_v14 = vld [vmem:[#allocation5 + $0x10] sm:$0xff]  ;;  %v68_v15 = vld [vmem:[#allocation5 + $0x8] sm:$0xff]  ;;  %v67_v16 = vld [vmem:[#allocation5] sm:$0xff] }
  0x2b   :  { %552 = vmatpush3.msra.mxu0 %v80_v2  ;;  %v783_v17 = vld [vmem:[#allocation2 + $0x8] sm:$0xff]  ;;  %v785_v18 = vld [vmem:[#allocation2 + $0x10] sm:$0xff]  ;;  %v789_v19 = vld [vmem:[#allocation2 + $0x18] sm:$0xff] }
  0x2c   :  { %553 = vmatprep.subr.mxu0 %v79_v3  ;;  %v791_v20 = vld [vmem:[#allocation2 + $0x20] sm:$0xff]  ;;  %v795_v21 = vld [vmem:[#allocation2 + $0x28] sm:$0xff]  ;;  %v797_v22 = vld [vmem:[#allocation2 + $0x30] sm:$0xff] }
  0x2d   :  { %554 = vmatpush3.msra.mxu0 %v79_v3  ;;  %v801_v23 = vld [vmem:[#allocation2 + $0x38] sm:$0xff]  ;;  %v280_v25 = vld [vmem:[#allocation7 + $0x70] sm:$0xff]  ;;  %v279_v26 = vld [vmem:[#allocation7 + $0x68] sm:$0xff] }
  0x2e   :  { %555 = vmatprep.subr.mxu0 %v78_v5  ;;  %v281_v24 = vld [vmem:[#allocation7 + $0x78] sm:$0xff]  ;;  %v278_v27 = vld [vmem:[#allocation7 + $0x60] sm:$0xff]  ;;  %v276_v29 = vld [vmem:[#allocation7 + $0x50] sm:$0xff] }
  0x2f   :  { %556 = vmatpush3.msra.mxu0 %v78_v5  ;;  %591 = vmatprep.subr.mxu1 %v281_v24  ;;  %v277_v28 = vld [vmem:[#allocation7 + $0x58] sm:$0xff]  ;;  %v275_v30 = vld [vmem:[#allocation7 + $0x48] sm:$0xff]  ;;  %v274_v31 = vld [vmem:[#allocation7 + $0x40] sm:$0xff] }
  0x30   :  { %557 = vmatprep.subr.mxu0 %v77_v6  ;;  %592 = vmatpush3.msra.mxu1 %v281_v24  ;;  %v273_v32 = vld [vmem:[#allocation7 + $0x38] sm:$0xff]  ;;  %v272_v33 = vld [vmem:[#allocation7 + $0x30] sm:$0xff]  ;;  %v271_v34 = vld [vmem:[#allocation7 + $0x28] sm:$0xff] }
  0x31   :  { %558 = vmatpush3.msra.mxu0 %v77_v6  ;;  %593 = vmatprep.subr.mxu1 %v280_v25  ;;  %v270_v35 = vld [vmem:[#allocation7 + $0x20] sm:$0xff]  ;;  %v269_v36 = vld [vmem:[#allocation7 + $0x18] sm:$0xff]  ;;  %v268_v37 = vld [vmem:[#allocation7 + $0x10] sm:$0xff] }
  0x32   :  { %559 = vmatprep.subr.mxu0 %v76_v7  ;;  %594 = vmatpush3.msra.mxu1 %v280_v25  ;;  %v267_v38 = vld [vmem:[#allocation7 + $0x8] sm:$0xff]  ;;  %v266_v39 = vld [vmem:[#allocation7] sm:$0xff] }
  0x33   :  { %560 = vmatpush3.msra.mxu0 %v76_v7  ;;  %595 = vmatprep.subr.mxu1 %v279_v26 }
  0x34   :  { %561 = vmatprep.subr.mxu0 %v75_v8  ;;  %596 = vmatpush3.msra.mxu1 %v279_v26 }
  0x35   :  { %562 = vmatpush3.msra.mxu0 %v75_v8  ;;  %597 = vmatprep.subr.mxu1 %v278_v27 }
  0x36   :  { %563 = vmatprep.subr.mxu0 %v74_v9  ;;  %598 = vmatpush3.msra.mxu1 %v278_v27 }
  0x37   :  { %564 = vmatpush3.msra.mxu0 %v74_v9  ;;  %599 = vmatprep.subr.mxu1 %v277_v28 }
  0x38   :  { %565 = vmatprep.subr.mxu0 %v73_v10  ;;  %600 = vmatpush3.msra.mxu1 %v277_v28 }
  0x39   :  { %566 = vmatpush3.msra.mxu0 %v73_v10  ;;  %601 = vmatprep.subr.mxu1 %v276_v29 }
  0x3a   :  { %567 = vmatprep.subr.mxu0 %v72_v11  ;;  %602 = vmatpush3.msra.mxu1 %v276_v29 }
  0x3b   :  { %568 = vmatpush3.msra.mxu0 %v72_v11  ;;  %603 = vmatprep.subr.mxu1 %v275_v30 }
  0x3c   :  { %569 = vmatprep.subr.mxu0 %v71_v12  ;;  %604 = vmatpush3.msra.mxu1 %v275_v30 }
  0x3d   :  { %570 = vmatpush3.msra.mxu0 %v71_v12  ;;  %605 = vmatprep.subr.mxu1 %v274_v31 }
  0x3e   :  { %571 = vmatprep.subr.mxu0 %v70_v13  ;;  %606 = vmatpush3.msra.mxu1 %v274_v31 }
  0x3f   :  { %572 = vmatpush3.msra.mxu0 %v70_v13  ;;  %607 = vmatprep.subr.mxu1 %v273_v32 }
  0x40   :  { %573 = vmatprep.subr.mxu0 %v69_v14  ;;  %608 = vmatpush3.msra.mxu1 %v273_v32  ;;  %v234_v32 = vlaneseq }
  0x41   :  { %574 = vmatpush3.msra.mxu0 %v69_v14  ;;  %609 = vmatprep.subr.mxu1 %v272_v33 }
  0x42   :  { %575 = vmatprep.subr.mxu0 %v68_v15  ;;  %610 = vmatpush3.msra.mxu1 %v272_v33  ;;  %v235_v33 = vshrl.u32 %v234_v32, 7 }
  0x43   :  { %576 = vmatpush3.msra.mxu0 %v68_v15  ;;  %611 = vmatprep.subr.mxu1 %v271_v34 }
  0x44   :  { %577 = vmatprep.subr.mxu0 %v67_v16  ;;  %612 = vmatpush3.msra.mxu1 %v271_v34  ;;  %v227_v34 = vld [vmem:[%s857_s3] sm:$0x1] }
  0x45   :  { %578 = vmatpush3.msra.mxu0 %v67_v16  ;;  %613 = vmatprep.subr.mxu1 %v270_v35 }
  0x46   :  { %580 = vmatmul.mubr.f32.vlgmr.msra.gmra.mxu0 %v783_v17  ;;  %614 = vmatpush3.msra.mxu1 %v270_v35  ;;  %v822_v35 = vsub.s32 0, %v235_v33 }
  0x47   :  { %582 = vmatprep.mubr.f32.mxu0 %v785_v18  ;;  %615 = vmatprep.subr.mxu1 %v269_v36 }
  0x48   :  { %616 = vmatpush3.msra.mxu1 %v269_v36 }
  0x49   :  { %617 = vmatprep.subr.mxu1 %v268_v37 }
  0x4a   :  { %583 = vmatmul.mubr.f32.gmra.mxu0 %v789_v19  ;;  %618 = vmatpush3.msra.mxu1 %v268_v37 }
  0x4b   :  { %585 = vmatprep.mubr.f32.mxu0 %v791_v20  ;;  %619 = vmatprep.subr.mxu1 %v267_v38 }
  0x4c   :  { %620 = vmatpush3.msra.mxu1 %v267_v38  ;;  %v231_v38 = vld [vmem:[%s857_s3 + $0x1] sm:$0x1] }
  0x4d   :  { %621 = vmatprep.subr.mxu1 %v266_v39 }
  0x4e   :  { %586 = vmatmul.mubr.f32.gmra.mxu0 %v795_v21  ;;  %622 = vmatpush3.msra.mxu1 %v266_v39 }
  0x4f   :  { %588 = vmatprep.mubr.f32.mxu0 %v797_v22 }
  0x52   :  { %589 = vmatmul.mubr.f32.gmra.mxu0 %v801_v23 }
 0x106   :  { %v581_v40 = vpop.f32.mrf.mxu0 }
 0x107   :  { %v203_v44 = vmul.f32 %v581_v40, %v581_v40 }
 0x108   :  { %v149_v41 = vpop.f32.mrf.mxu0 }
 0x109   :  { %v202_v42 = vmul.f32 %v149_v41, %v149_v41  ;;  %v188_v45 = vadd.f32 %v581_v40, %v149_v41 }
 0x10a   :  { %v804_v43 = vpop.f32.mrf.mxu0 }
 0x10b   :  { %v210_v47 = vadd.f32 %v203_v44, %v202_v42  ;;  %v205_v51 = vmul.f32 %v804_v43, %v804_v43 }
 0x10c   :  { %v159_v46 = vpop.f32.mrf.mxu0 }
 0x10d   :  { %v189_v48 = vadd.f32 %v188_v45, %v159_v46  ;;  %v204_v49 = vmul.f32 %v159_v46, %v159_v46 }
 0x10e   :  { %v806_v50 = vpop.f32.mrf.mxu0 }
 0x10f   :  { %v211_v52 = vadd.f32 %v210_v47, %v204_v49  ;;  %v190_v53 = vadd.f32 %v804_v43, %v189_v48  ;;  %v207_v59 = vmul.f32 %v806_v50, %v806_v50 }
 0x110   :  { %v169_v54 = vpop.f32.mrf.mxu0 }
 0x111   :  { %v191_v55 = vadd.f32 %v190_v53, %v169_v54  ;;  %v206_v56 = vmul.f32 %v169_v54, %v169_v54  ;;  %v212_v57 = vadd.f32 %v211_v52, %v205_v51 }
 0x112   :  { %v811_v58 = vpop.f32.mrf.mxu0 }
 0x113   :  { %v213_v60 = vadd.f32 %v212_v57, %v206_v56  ;;  %v192_v61 = vadd.f32 %v806_v50, %v191_v55  ;;  %v209_v2 = vmul.f32 %v811_v58, %v811_v58 }
 0x114   :  { %v179_v62 = vpop.f32.mrf.mxu0 }
 0x115   :  { %v193_v63 = vadd.f32 %v192_v61, %v179_v62  ;;  %v208_v0 = vmul.f32 %v179_v62, %v179_v62  ;;  %v214_v1 = vadd.f32 %v213_v60, %v207_v59 }
 0x117   :  { %v194_v3 = vadd.f32 %v811_v58, %v193_v63  ;;  %v215_v5 = vadd.f32 %v214_v1, %v208_v0 }
 0x119   :  { %v195_v6 = vrot.slane %v194_v3, 4  ;;  %v216_v7 = vadd.f32 %v215_v5, %v209_v2 }
 0x11b   :  { %v196_v8 = vadd.f32 %v195_v6, %v194_v3  ;;  %v217_v9 = vrot.slane %v216_v7, 4 }
 0x11d   :  { %v197_v10 = vrot.slane %v196_v8, 2  ;;  %v218_v11 = vadd.f32 %v217_v9, %v216_v7 }
 0x11f   :  { %v198_v12 = vadd.f32 %v197_v10, %v196_v8  ;;  %v219_v13 = vrot.slane %v218_v11, 2 }
 0x121   :  { %v199_v14 = vrot.slane %v198_v12, 1  ;;  %v220_v15 = vadd.f32 %v219_v13, %v218_v11 }
 0x123   :  { %v200_v16 = vadd.f32 %v199_v14, %v198_v12  ;;  %v221_v24 = vrot.slane %v220_v15, 1 }
 0x125   :  { %v201_v25 = vmul.f32 0.015625, %v200_v16  ;;  %v222_v26 = vadd.f32 %v221_v24, %v220_v15 }
 0x127   :  { %v223_v27 = vmul.f32 0.015625, %v222_v26  ;;  %v224_v28 = vmul.f32 %v201_v25, %v201_v25 }
 0x129   :  { %v225_v29 = vsub.f32 %v223_v27, %v224_v28 }
 0x12b   :  { %v226_v30 = vmax.f32 %v225_v29, 0.0 }
 0x12d   :  { %v228_v31 = vadd.f32 1e-05, %v226_v30 }
 0x12f   :  { %641 = vrsqrt.f32 %v228_v31 }
 0x13c   :  { %v642_v36 = vpop.eup %641 }
 0x13d   :  { %v230_v37 = vmul.f32 %v642_v36, %v227_v34 }
 0x13f   :  { %v232_v39 = vmul.f32 %v230_v37, %v201_v25  ;;  %v237_v42 = vrot.slane %v230_v37, %v822_v35 }
 0x141   :  { %v233_v44 = vsub.f32 %v231_v38, %v232_v39  ;;  %v238_v47 = vmul.f32 %v237_v42, %v149_v41  ;;  %v239_v48 = vmul.f32 %v581_v40, %v237_v42  ;;  %v240_v49 = vmul.f32 %v237_v42, %v159_v46 }
 0x142   :  { %v241_v55 = vmul.f32 %v804_v43, %v237_v42  ;;  %v242_v59 = vmul.f32 %v237_v42, %v169_v54  ;;  %v243_v0 = vmul.f32 %v806_v50, %v237_v42  ;;  %v244_v1 = vmul.f32 %v237_v42, %v179_v62 }
 0x143   :  { %v249_v45 = vrot.slane %v233_v44, %v822_v35  ;;  %v245_v3 = vmul.f32 %v811_v58, %v237_v42 }
 0x145   :  { %v250_v51 = vadd.f32 %v249_v45, %v238_v47  ;;  %v251_v52 = vadd.f32 %v249_v45, %v239_v48  ;;  %v252_v53 = vadd.f32 %v249_v45, %v240_v49  ;;  %v253_v60 = vadd.f32 %v249_v45, %v241_v55 }
 0x146   :  { %v254_v63 = vadd.f32 %v249_v45, %v242_v59  ;;  %v255_v40 = vadd.f32 %v249_v45, %v243_v0  ;;  %v256_v46 = vadd.f32 %v249_v45, %v244_v1  ;;  %v257_v5 = vadd.f32 %v249_v45, %v245_v3 }
 0x147   :  { %v258_v56 = vmax.f32 %v250_v51, 0.0  ;;  %v259_v57 = vmax.f32 %v251_v52, 0.0  ;;  %v260_v61 = vmax.f32 %v252_v53, 0.0  ;;  %v261_v41 = vmax.f32 %v253_v60, 0.0 }
 0x148   :  { %v262_v2 = vmax.f32 %v254_v63, 0.0  ;;  %v263_v43 = vmax.f32 %v255_v40, 0.0  ;;  %v264_v54 = vmax.f32 %v256_v46, 0.0  ;;  %v265_v6 = vmax.f32 %v257_v5, 0.0  ;;  %v426_v46 = vld [vmem:[%s857_s3 + $0x2] sm:$0x1] }
 0x149   :  { %623 = vmatprep.mubr.f32.mxu1 %v258_v56 }
 0x14a   :  { %624 = vmatmul.mubr.f32.vlgmr.msra.gmra.mxu1 %v259_v57 }
 0x14b   :  { %626 = vmatprep.mubr.f32.mxu1 %v260_v61 }
 0x14e   :  { %627 = vmatmul.mubr.f32.gmra.mxu1 %v261_v41 }
 0x14f   :  { %629 = vmatprep.mubr.f32.mxu1 %v262_v2 }
 0x152   :  { %630 = vmatmul.mubr.f32.gmra.mxu1 %v263_v43  ;;  %v430_v43 = vld [vmem:[%s857_s3 + $0x3] sm:$0x1]  ;;  %s736_s3 = smov [#allocation8]  }
 0x153   :  { %632 = vmatprep.mubr.f32.mxu1 %v264_v54  ;;  %s486_s11 = sshll.u32 %s736_s3, 4  ;;  %s487_s11 = int_to_ptr.vmem [resolvable:$true] %s486_s11 }
 0x154   :  { %s705_s12 = scalar_lea.vmem %s487_s11, 1024  ;;  %p710_p2 = scmp.lt.s32.totalorder %s487_s11, %s487_s11 }
 0x155   :  { %p706_p1 = scmp.ne.s32.totalorder %s487_s11, %s705_s12  ;;  %p711_p3 = scmp.lt.s32.totalorder %s705_s12, %s705_s12 }
 0x156   :  { %633 = vmatmul.mubr.f32.gmra.mxu1 %v265_v6 }
 0x157   :  { %p712_p4 = por %p711_p3, %p710_p2 }
 0x159   :  { %p713_p5 = pnand %p712_p4, %p706_p1 }
 0x20a   :  { %v625_v7 = vpop.f32.mrf.mxu1 }
 0x20b   :  { %v402_v9 = vmul.f32 %v625_v7, %v625_v7 }
 0x20c   :  { %v348_v8 = vpop.f32.mrf.mxu1 }
 0x20d   :  { %v401_v50 = vmul.f32 %v348_v8, %v348_v8  ;;  %v387_v10 = vadd.f32 %v625_v7, %v348_v8 }
 0x20e   :  { %v628_v62 = vpop.f32.mrf.mxu1 }
 0x20f   :  { %v409_v12 = vadd.f32 %v402_v9, %v401_v50  ;;  %v404_v58 = vmul.f32 %v628_v62, %v628_v62 }
 0x210   :  { %v358_v11 = vpop.f32.mrf.mxu1 }
 0x211   :  { %v388_v13 = vadd.f32 %v387_v10, %v358_v11  ;;  %v403_v14 = vmul.f32 %v358_v11, %v358_v11 }
 0x212   :  { %v631_v15 = vpop.f32.mrf.mxu1 }
 0x213   :  { %v410_v16 = vadd.f32 %v409_v12, %v403_v14  ;;  %v389_v24 = vadd.f32 %v628_v62, %v388_v13  ;;  %v406_v30 = vmul.f32 %v631_v15, %v631_v15 }
 0x214   :  { %v368_v25 = vpop.f32.mrf.mxu1 }
 0x215   :  { %v390_v26 = vadd.f32 %v389_v24, %v368_v25  ;;  %v405_v27 = vmul.f32 %v368_v25, %v368_v25  ;;  %v411_v28 = vadd.f32 %v410_v16, %v404_v58 }
 0x216   :  { %v634_v29 = vpop.f32.mrf.mxu1 }
 0x217   :  { %v412_v31 = vadd.f32 %v411_v28, %v405_v27  ;;  %v391_v32 = vadd.f32 %v631_v15, %v390_v26  ;;  %v408_v38 = vmul.f32 %v634_v29, %v634_v29 }
 0x218   :  { %v378_v33 = vpop.f32.mrf.mxu1 }
 0x219   :  { %v392_v34 = vadd.f32 %v391_v32, %v378_v33  ;;  %v407_v36 = vmul.f32 %v378_v33, %v378_v33  ;;  %v413_v37 = vadd.f32 %v412_v31, %v406_v30 }
 0x21b   :  { %v393_v39 = vadd.f32 %v634_v29, %v392_v34  ;;  %v414_v42 = vadd.f32 %v413_v37, %v407_v36 }
 0x21d   :  { %v394_v44 = vrot.slane %v393_v39, 4  ;;  %v415_v45 = vadd.f32 %v414_v42, %v408_v38 }
 0x21f   :  { %v395_v47 = vadd.f32 %v394_v44, %v393_v39  ;;  %v416_v48 = vrot.slane %v415_v45, 4 }
 0x221   :  { %v396_v49 = vrot.slane %v395_v47, 2  ;;  %v417_v51 = vadd.f32 %v416_v48, %v415_v45 }
 0x223   :  { %v397_v52 = vadd.f32 %v396_v49, %v395_v47  ;;  %v418_v53 = vrot.slane %v417_v51, 2 }
 0x225   :  { %v398_v55 = vrot.slane %v397_v52, 1  ;;  %v419_v56 = vadd.f32 %v418_v53, %v417_v51 }
 0x227   :  { %v399_v57 = vadd.f32 %v398_v55, %v397_v52  ;;  %v420_v59 = vrot.slane %v419_v56, 1 }
 0x229   :  { %v400_v60 = vmul.f32 0.015625, %v399_v57  ;;  %v421_v61 = vadd.f32 %v420_v59, %v419_v56 }
 0x22b   :  { %v422_v63 = vmul.f32 0.015625, %v421_v61  ;;  %v423_v0 = vmul.f32 %v400_v60, %v400_v60 }
 0x22d   :  { %v424_v1 = vsub.f32 %v422_v63, %v423_v0 }
 0x22f   :  { %v425_v41 = vmax.f32 %v424_v1, 0.0 }
 0x231   :  { %v427_v40 = vadd.f32 1e-05, %v425_v41 }
 0x233   :  { %643 = vrsqrt.f32 %v427_v40 }
 0x240   :  { %v644_v2 = vpop.eup %643 }
 0x241   :  { %v429_v3 = vmul.f32 %v644_v2, %v426_v46 }
 0x243   :  { %v431_v5 = vmul.f32 %v429_v3, %v400_v60  ;;  %v436_v54 = vrot.slane %v429_v3, %v822_v35 }
 0x245   :  { %v432_v6 = vsub.f32 %v430_v43, %v431_v5  ;;  %v443_v50 = vmul.f32 %v436_v54, %v378_v33  ;;  %v437_v10 = vmul.f32 %v436_v54, %v348_v8  ;;  %v438_v12 = vmul.f32 %v625_v7, %v436_v54 }
 0x246   :  { %v439_v13 = vmul.f32 %v436_v54, %v358_v11  ;;  %v440_v14 = vmul.f32 %v628_v62, %v436_v54  ;;  %v441_v58 = vmul.f32 %v436_v54, %v368_v25  ;;  %v442_v16 = vmul.f32 %v631_v15, %v436_v54 }
 0x247   :  { %v448_v9 = vrot.slane %v432_v6, %v822_v35  ;;  %v444_v24 = vmul.f32 %v634_v29, %v436_v54 }
 0x249   :  { %v455_v26 = vadd.f32 %v448_v9, %v443_v50  ;;  %v449_v27 = vadd.f32 %v448_v9, %v437_v10  ;;  %v450_v28 = vadd.f32 %v448_v9, %v438_v12  ;;  %v451_v30 = vadd.f32 %v448_v9, %v439_v13 }
 0x24a   :  { %v452_v31 = vadd.f32 %v448_v9, %v440_v14  ;;  %v453_v32 = vadd.f32 %v448_v9, %v441_v58  ;;  %v454_v34 = vadd.f32 %v448_v9, %v442_v16  ;;  %v456_v36 = vadd.f32 %v448_v9, %v444_v24 }
 0x24b   :  { %v463_v37 = vadd.f32 %v455_v26, %v797_v22  ;;  %v457_v33 = vadd.f32 %v449_v27, %v780_v4  ;;  %v458_v35 = vadd.f32 %v450_v28, %v783_v17  ;;  %v459_v7 = vadd.f32 %v451_v30, %v785_v18 }
 0x24c   :  { %v460_v8 = vadd.f32 %v452_v31, %v789_v19  ;;  %v461_v62 = vadd.f32 %v453_v32, %v791_v20  ;;  %v462_v11 = vadd.f32 %v454_v34, %v795_v21  ;;  %v464_v15 = vadd.f32 %v456_v36, %v801_v23 }
 0x24d   :  { %v471_v25 = vmax.f32 %v463_v37, 0.0  ;;  %v465_v29 = vmax.f32 %v457_v33, 0.0  ;;  %v466_v38 = vmax.f32 %v458_v35, 0.0  ;;  %v467_v22 = vmax.f32 %v459_v7, 0.0 }
 0x24e   :  { %v468_v39 = vmax.f32 %v460_v8, 0.0  ;;  %v469_v4 = vmax.f32 %v461_v62, 0.0  ;;  %v470_v42 = vmax.f32 %v462_v11, 0.0  ;;  %v472_v17 = vmax.f32 %v464_v15, 0.0 }
 0x24f   :  { %479 = vst [vmem:[#allocation8 + $0x30] sm:$0xff] %v471_v25  ;;  %473 = vst [vmem:[#allocation8] sm:$0xff] %v465_v29 }
 0x250   :  { %474 = vst [vmem:[#allocation8 + $0x8] sm:$0xff] %v466_v38  ;;  %475 = vst [vmem:[#allocation8 + $0x10] sm:$0xff] %v467_v22 }
 0x251   :  { %476 = vst [vmem:[#allocation8 + $0x18] sm:$0xff] %v468_v39  ;;  %477 = vst [vmem:[#allocation8 + $0x20] sm:$0xff] %v469_v4 }
 0x252   :  { %478 = vst [vmem:[#allocation8 + $0x28] sm:$0xff] %v470_v42  ;;  %480 = vst [vmem:[#allocation8 + $0x38] sm:$0xff] %v472_v17 }
 0x253   :  { %716 = shalt.err (!%p713_p5)
}
 0x254   :  { %492 = dma.vmem_to_hbm [thread:$0]  %s487_s11, 1024, %s858_s4, [#allocation4], %s733_s20, %s733_s20, %s734_s21  }
 0x255   :  { %729 = dma.done.wait [#allocation4], 1024  }
 0x256   :  { %730 = vsyncadd [#allocation4], 4294966272 }
 0x257   :  { %496 = vsyncpa [#allocation3], 1 }
 0x258   :  { %497 = vsyncpa [#allocation6], 1 }
 0x259   :  { %498 = vsyncpa [#allocation4], 1 }

</bundles_post_ra>
